<compile_context>
chip_gen: v7x
topology: tpu7x:2x2x1
jax: 0.10.0
libtpu: 0.0.40
codegen_flags: <defaults>
</compile_context>

<pallas_src>
import math
import functools

import jax
import jax.numpy as jnp
from jax import lax
from jax.experimental import pallas as pl
from jax.experimental.pallas import tpu as pltpu


_BLOCK_BYTES = 4 * 1024 * 1024         # target bytes per x / out block
_PE_RESIDENT_BYTES = 8 * 1024 * 1024   # keep pe fully VMEM-resident below this
_VMEM_FLOOR = 16 * 1024 * 1024
_VMEM_CAP = 48 * 1024 * 1024           # headroom under v7x's 64 MiB physical VMEM
_GOLDEN_I32 = -1640531527              # 0x9E3779B9 as two's-complement int32


def _choose_row_tile(n_rows: int, n_cols: int, period: int,
                     itemsize: int, max_block_bytes: int) -> int:
    """Largest legal row tile for the flattened (n_rows, n_cols) view.

    Constraints:
      * divides n_rows (clean grid)
      * multiple of 8 sublanes, or equal to the full row extent
      * block bytes <= max_block_bytes
      * pe stays alignable: tile divides `period`, or tile is a multiple of it
    """
    rows_budget = max(1, max_block_bytes // max(1, n_cols * itemsize))
    limit = min(rows_budget, n_rows)
    for t in range(limit, 0, -1):
        if n_rows % t:
            continue
        if not (t % 8 == 0 or t == n_rows):
            continue
        if period % t == 0 or t % period == 0:
            return t
    # TODO(synk): pathological shapes (prime row counts, no aligned divisor)
    # fall back to a single full block; revisit for huge arrays.
    return n_rows


def _make_kernel(p: float, training: bool, tile_rows: int, n_cols: int,
                 pe_slice_blocks):
    """Kernel body factory. `p`, `training`, shapes are static.

    pe_slice_blocks: None  -> pe block exactly matches the x block (use as-is)
                     int k -> pe is a resident (k*tile_rows, n_cols) table;
                              slice the needed rows with pl.ds.
    """
    keep_threshold = min(int(round(p * 4294967296.0)), 0xFFFFFFFF)
    # p == 1.0 edge case: threshold clamps to 0xFFFFFFFF so a ~2^-32 sliver of
    # elements still passes the keep test, but inv_keep == 0 zeroes them anyway
    # -> output is all zeros, matching nn.Dropout(p=1.0).
    inv_keep = 1.0 / (1.0 - p) if p < 1.0 else 0.0

    def kernel(seed_ref, x_ref, pe_ref, o_ref):
        if pe_slice_blocks is None:
            pe_tile = pe_ref[...]
        else:
            off = (pl.program_id(0) % pe_slice_blocks) * tile_rows
            off = pl.multiple_of(off, tile_rows)        # aligned sublane start
            pe_tile = pe_ref[pl.ds(off, tile_rows), :]

        # Compute in f32, single cast at the store (correct for bf16 inputs).
        y = x_ref[...].astype(jnp.float32) + pe_tile.astype(jnp.float32)

        if training and p > 0.0:
            # Stateless counter-based RNG (plain VPU int ops; also works in
            # interpret mode).  Scalar-side (sreg) math: per-block base counter
            # and seed mix; the int32 wrap for tensors > 2^31 elements is
            # benign (counters stay unique up to 2^32 elements).
            shape = (tile_rows, n_cols)
            rows = lax.broadcasted_iota(jnp.int32, shape, 0)
            cols = lax.broadcasted_iota(jnp.int32, shape, 1)
            base = pl.program_id(0) * (tile_rows * n_cols)          # scalar
            seed_mix = seed_ref[0] * jnp.int32(_GOLDEN_I32)         # scalar
            lin = rows * n_cols + cols + base
            u = pltpu.bitcast(lin ^ seed_mix, jnp.uint32)
            # lowbias-style mix, one multiply round (enough avalanche for a
            # Bernoulli threshold; v7x training mode is VALU-bound).
            u = (u ^ (u >> 16)) * jnp.uint32(0x7FEB352D)
            u = u ^ (u >> 13)
            keep = u >= jnp.uint32(keep_threshold)   # keep prob = 1 - p
            y = jnp.where(keep, y * jnp.float32(inv_keep), jnp.float32(0.0))

        o_ref[...] = y.astype(o_ref.dtype)

    return kernel


@functools.partial(
    jax.jit,
    static_argnames=("p", "training", "donate_x", "max_block_bytes"))
def positional_encoding_forward(x, pe, seed, *, p: float = 0.1,
                                training: bool = False,
                                donate_x: bool = False,
                                max_block_bytes: int = _BLOCK_BYTES):
    """
    Args:
        x:    (B, S, D) input embeddings.
        pe:   (max_seq_len, D) sinusoidal table (buffer), max_seq_len >= S.
        seed: int32 scalar, dropout PRNG seed (ignored in eval mode).
    Returns:
        (B, S, D) embeddings with positional encoding (and dropout if training).
    """
    batch, seq, d_model = x.shape
    assert pe.shape[0] >= seq and pe.shape[1] == d_model

    # ---- pick a lane-dense 2-D working view --------------------------------
    if d_model % 128 == 0:
        n_cols = d_model
    elif (seq * d_model) % 128 == 0:
        n_cols = 128          # re-fold so the stored last dim is lane-dense
    else:
        # TODO(synk): shapes where neither D nor S*D is a multiple of 128 fall
        # back to a (rows, D) layout with masked partial stores.
        n_cols = d_model
    n_rows = (batch * seq * d_model) // n_cols
    period = (seq * d_model) // n_cols       # pe repeats every `period` rows

    itemsize = jnp.dtype(x.dtype).itemsize
    tile_rows = _choose_row_tile(n_rows, n_cols, period, itemsize,
                                 max_block_bytes)
    n_blocks = n_rows // tile_rows

    x2d = x.reshape(n_rows, n_cols)
    # Cast pe to x.dtype once (halves the pe stream for bf16 models).
    pe_flat = pe[:seq].astype(x.dtype).reshape(period, n_cols)

    pe_bytes = period * n_cols * itemsize
    if pe_bytes <= _PE_RESIDENT_BYTES:
        # Resident pe: constant block index => fetched from HBM exactly once.
        if tile_rows >= period:
            reps = tile_rows // period
            pe_arg = pe_flat if reps == 1 else jnp.tile(pe_flat, (reps, 1))
            pe_slice_blocks = None            # pe block == x block, use as-is
        else:
            pe_arg = pe_flat
            pe_slice_blocks = period // tile_rows   # slice rows in-kernel
        pe_index = lambda i, seed_ref: (0, 0)
        pe_block_shape = tuple(pe_arg.shape)
    else:
        # Streaming fallback for huge pe tables (tile_rows divides period here).
        pe_arg = pe_flat
        pe_slice_blocks = None
        blocks_per_period = period // tile_rows
        pe_index = lambda i, seed_ref: (i % blocks_per_period, 0)
        pe_block_shape = (tile_rows, n_cols)

    kernel = _make_kernel(p, training, tile_rows, n_cols, pe_slice_blocks)

    # Explicit VMEM budget: x + out double-buffered, pe (2 buffers), slack.
    blk_bytes = tile_rows * n_cols * itemsize
    pe_buf_bytes = pe_block_shape[0] * pe_block_shape[1] * itemsize
    vmem_need = 4 * blk_bytes + 2 * pe_buf_bytes + (2 << 20)
    vmem_limit = int(min(max(vmem_need, _VMEM_FLOOR), _VMEM_CAP))

    grid_spec = pltpu.PrefetchScalarGridSpec(
        num_scalar_prefetch=1,                   # seed lands in SMEM
        grid=(n_blocks,),
        in_specs=[
            pl.BlockSpec((tile_rows, n_cols), lambda i, seed_ref: (i, 0)),  # x
            pl.BlockSpec(pe_block_shape, pe_index),                         # pe
        ],
        out_specs=pl.BlockSpec((tile_rows, n_cols), lambda i, seed_ref: (i, 0)),
    )

    out2d = pl.pallas_call(
        kernel,
        out_shape=jax.ShapeDtypeStruct((n_rows, n_cols), x.dtype),
        grid_spec=grid_spec,
        compiler_params=pltpu.CompilerParams(
            # Blocks are fully independent (stateless per-element RNG), so the
            # grid axis can be sharded across TensorCores on v7x.
            dimension_semantics=("parallel",),
            vmem_limit_bytes=vmem_limit,
        ),
        # Operand indices count the scalar-prefetch arg: 0=seed, 1=x2d, 2=pe.
        # Only alias when the caller actually donates x (avoids an XLA copy).
        input_output_aliases={1: 0} if donate_x else {},
    )(jnp.reshape(seed, (1,)).astype(jnp.int32), x2d, pe_arg)

    return out2d.reshape(batch, seq, d_model)


def build_sinusoidal_pe(d_model: int, max_seq_len: int) -> jnp.ndarray:
    """Deterministic buffer construction, mirroring the PyTorch __init__."""
    position = jnp.arange(max_seq_len, dtype=jnp.float32)[:, None]       # (L, 1)
    div_term = jnp.exp(
        jnp.arange(0, d_model, 2, dtype=jnp.float32)
        * (-math.log(10000.0) / d_model))                                # (D/2,)
    angles = position * div_term                                         # (L, D/2)
    pe = jnp.stack([jnp.sin(angles), jnp.cos(angles)], axis=-1)          # (L, D/2, 2)
    return pe.reshape(max_seq_len, d_model)                              # (L, D)


if __name__ == "__main__":
    # Small shapes consistent with the module's (batch, seq, d_model) input.
    B, S, D = 2, 8, 32
    MAX_SEQ_LEN = 64
    DROPOUT_P = 0.1

    key = jax.random.PRNGKey(0)
    x = jax.random.normal(key, (B, S, D), dtype=jnp.float32)
    pe = build_sinusoidal_pe(D, MAX_SEQ_LEN)
    seed = jnp.array(42, dtype=jnp.int32)

    ref = x + pe[None, :S, :]

    # Eval mode: dropout is the identity — must match the reference exactly.
    y_eval = jax.block_until_ready(
        positional_encoding_forward(x, pe, seed, p=DROPOUT_P, training=False))
    assert y_eval.shape == (B, S, D)
    assert jnp.allclose(y_eval, ref, atol=1e-6, rtol=1e-6), "eval mismatch vs reference"

    # Training mode: inverted dropout — every element is either 0 or ref/(1-p).
    y_train = jax.block_until_ready(
        positional_encoding_forward(x, pe, seed, p=DROPOUT_P, training=True))
    assert y_train.shape == (B, S, D)
    scaled = ref * jnp.float32(1.0 / (1.0 - DROPOUT_P))
    ok = jnp.logical_or(
        y_train == 0.0,
        jnp.abs(y_train - scaled) <= 1e-5 * (1.0 + jnp.abs(scaled)),
    )
    assert bool(jnp.all(ok)), "training output is not {0, ref/(1-p)}"

    # Second config: D a multiple of 128 with a tiny block budget to exercise
    # the resident-pe + in-kernel pl.ds slice path (tile_rows < period).
    B2, S2, D2 = 2, 16, 128
    x2 = jax.random.normal(jax.random.PRNGKey(1), (B2, S2, D2), dtype=jnp.float32)
    pe2 = build_sinusoidal_pe(D2, 32)
    y2 = jax.block_until_ready(
        positional_encoding_forward(x2, pe2, seed, p=DROPOUT_P, training=False,
                                    max_block_bytes=8 * 128 * 4))
    ref2 = x2 + pe2[None, :S2, :]
    assert jnp.allclose(y2, ref2, atol=1e-6, rtol=1e-6), "slice-path mismatch"

    print("KERNEL_OK")
</pallas_src>

<mosaic_0001>
module attributes {stable_mosaic.version = 11 : i64} {
  func.func @kernel(%arg0: i32, %arg1: memref<1xi32, #tpu.memory_space<smem>>, %arg2: memref<4x128xf32, #tpu.memory_space<vmem>>, %arg3: memref<4x128xf32, #tpu.memory_space<vmem>>, %arg4: memref<4x128xf32, #tpu.memory_space<vmem>>) attributes {dimension_semantics = [#tpu.dimension_semantics<parallel>], iteration_bounds = array<i64: 1>, scalar_prefetch = 1 : i64, scratch_operands = 0 : i64, tpu.core_type = #tpu.core_type<tc>, window_params = [{transform_indices = @transform_0, window_bounds = array<i64: 4, 128>}, {pipeline_mode = #tpu.pipeline_mode<synchronous>, transform_indices = @transform_1, window_bounds = array<i64: 4, 128>}, {transform_indices = @transform_2, window_bounds = array<i64: 4, 128>}]} {
    %c0 = arith.constant 0 : index
    %c0_0 = arith.constant 0 : index
    %0 = vector.load %arg3[%c0, %c0_0] : memref<4x128xf32, #tpu.memory_space<vmem>>, vector<4x128xf32>
    %c0_1 = arith.constant 0 : index
    %c0_2 = arith.constant 0 : index
    %1 = vector.load %arg2[%c0_1, %c0_2] : memref<4x128xf32, #tpu.memory_space<vmem>>, vector<4x128xf32>
    %2 = arith.addf %1, %0 : vector<4x128xf32>
    %c0_3 = arith.constant 0 : index
    %c0_4 = arith.constant 0 : index
    %3 = vector.load %arg4[%c0_3, %c0_4] : memref<4x128xf32, #tpu.memory_space<vmem>>, vector<4x128xf32>
    tpu.vector_store %arg4[%c0_3, %c0_4], %2 {strides = array<i32>} : memref<4x128xf32, #tpu.memory_space<vmem>>, vector<4x128xf32>,
    return
  }
  func.func @transform_0(%arg0: i32, %arg1: memref<1xi32, #tpu.memory_space<smem>>) -> (i32, i32) {
    %c0_i32 = arith.constant 0 : i32
    %c0_i32_0 = arith.constant 0 : i32
    return %arg0, %c0_i32 : i32, i32
  }
  func.func @transform_1(%arg0: i32, %arg1: memref<1xi32, #tpu.memory_space<smem>>) -> (i32, i32) {
    %c0_i32 = arith.constant 0 : i32
    %c0_i32_0 = arith.constant 0 : i32
    %c0_i32_1 = arith.constant 0 : i32
    return %c0_i32, %c0_i32_0 : i32, i32
  }
  func.func @transform_2(%arg0: i32, %arg1: memref<1xi32, #tpu.memory_space<smem>>) -> (i32, i32) {
    %c0_i32 = arith.constant 0 : i32
    %c0_i32_0 = arith.constant 0 : i32
    return %arg0, %c0_i32 : i32, i32
  }
}

</mosaic_0001>

<bundles_post_ra>
// kernel: positional_encoding_forward.1
= control target key start
LH: loop header
LB: loop body
LE: loop exit
PB: predicated region body
PF: predicated region fallthrough
CT: control target
= control target key end

     0   :  { %s50_s0 = inlined_call_operand.<no memory space> [shape: s32[1], index: 0, kind: input, shape index: {}]   ;;  %s51_s1 = inlined_call_operand.vmem [shape: f32[4,128], index: 1, kind: input, shape index: {}]   ;;  %s52_s2 = inlined_call_operand.vmem [shape: f32[4,128], index: 2, kind: input, shape index: {}]   ;;  %s53_s3 = inlined_call_operand.vmem [shape: f32[4,128], index: 3, kind: output, shape index: {}]  }
   0x1   :  { %v13_v0 = vld [vmem:[%s52_s2] sm:$0xf] }
   0x2   :  { %v14_v1 = vld [vmem:[%s51_s1] sm:$0xf] }
   0x3   :  { %v15_v2 = vadd.f32 %v14_v1, %v13_v0 }
   0x5   :  { %16 = vst [vmem:[%s53_s3] sm:$0xf] %v15_v2 }

</bundles_post_ra>
